<compile_context>
chip_gen: v6e
topology: v6e:2x2x1
jax: 0.10.0
libtpu: 0.0.40
codegen_flags: <defaults>
</compile_context>

<pallas_src>
import functools
import math

import jax
import jax.numpy as jnp
from jax.experimental import pallas as pl
from jax.experimental.pallas import tpu as pltpu

BN_EPS = 1e-5


def _round_up(x, m):
    return ((x + m - 1) // m) * m


def _choose_tile(batch, max_tile_b):
    """256-aligned tiles for the MXU; small explicit overrides stay 16-aligned."""
    if max_tile_b < 256:
        return max(16, _round_up(max_tile_b, 16))       # bf16 sublane packing
    n = -(-batch // max_tile_b)                          # desired grid steps
    per = _round_up(-(-batch // n), 256)                 # even-ish, 256-aligned
    return min(_round_up(max_tile_b, 256), per)


# ----------------------------------------------------------------------------
# Fused kernel: pass 0 = fc1+relu + BN statistics, pass 1 = BN + fc2 + fc3.
# ----------------------------------------------------------------------------
def _fused_kernel(x_ref, w1_ref, b1_ref, w2_ref, b2_ref, w3_ref, b3_ref,
                  o_ref, h1_sc, sum_sc, sq_sc, mean_sc, rstd_sc,
                  *, batch, tile_b, keep_h1, mask_last):
    p = pl.program_id(0)                 # 0 = stats pass, 1 = forward pass
    i = pl.program_id(1)                 # batch-tile index
    nb = pl.num_programs(1)

    def fc1():
        h = jnp.dot(x_ref[...], w1_ref[...], preferred_element_type=jnp.float32)
        return jnp.maximum(h + b1_ref[...], 0.0)

    # ---------------- pass 0: fc1 + relu, accumulate BN statistics ----------
    @pl.when(p == 0)
    def _stats():
        @pl.when(i == 0)
        def _():
            sum_sc[...] = jnp.zeros_like(sum_sc)
            sq_sc[...] = jnp.zeros_like(sq_sc)

        h1 = fc1()

        if keep_h1:
            start = pl.multiple_of(i * tile_b, tile_b)
            h1_sc[pl.ds(start, tile_b), :] = h1

        def accumulate(h):
            sum_sc[...] += jnp.sum(h, axis=0, keepdims=True)
            sq_sc[...] += jnp.sum(h * h, axis=0, keepdims=True)

        if mask_last:
            # Only the final tile contains padding rows -> mask only there.
            @pl.when(i == nb - 1)
            def _():
                rows = i * tile_b + jax.lax.broadcasted_iota(
                    jnp.int32, (tile_b, 1), 0)
                accumulate(jnp.where(rows < batch, h1, 0.0))

            @pl.when(i != nb - 1)
            def _():
                accumulate(h1)
        else:
            accumulate(h1)

        @pl.when(i == nb - 1)
        def _finalize():
            inv_n = 1.0 / batch
            mean = sum_sc[...] * inv_n
            var = jnp.maximum(sq_sc[...] * inv_n - mean * mean, 0.0)  # biased
            mean_sc[...] = mean
            rstd_sc[...] = jax.lax.rsqrt(var + BN_EPS)

    # ---------------- pass 1: BN normalize -> fc2 + relu -> fc3 -------------
    @pl.when(p == 1)
    def _forward():
        if keep_h1:
            start = pl.multiple_of(i * tile_b, tile_b)
            h1 = h1_sc[pl.ds(start, tile_b), :]
        else:
            h1 = fc1()

        hn = (h1 - mean_sc[...]) * rstd_sc[...]          # BN, gamma=1 beta=0

        h2 = jnp.dot(hn.astype(jnp.bfloat16), w2_ref[...],
                     preferred_element_type=jnp.float32)
        h2 = jnp.maximum(h2 + b2_ref[...], 0.0)

        # fc3 (N=1) lane-dense on the MXU: (1, F2) x (tile_b, F2)^T -> (1, tile_b)
        out = jax.lax.dot_general(
            w3_ref[...], h2.astype(jnp.bfloat16),
            (((1,), (1,)), ((), ())),
            preferred_element_type=jnp.float32)
        o_ref[...] = out + b3_ref[0, 0]


def value_forward(state, params, *, max_tile_b=2048, keep_h1=None):
    """Value/Critic forward. state: (B, D) f32 -> (B, 1) f32."""
    w1, b1, w2, b2, w3, b3 = params
    B, D = state.shape
    F1 = w1.shape[1]
    F2 = w2.shape[1]

    tile_b = _choose_tile(B, max_tile_b)
    b_pad = _round_up(B, tile_b)
    nb = b_pad // tile_b
    mask_last = b_pad != B
    if keep_h1 is None:
        keep_h1 = b_pad * F1 * 4 <= 8 * 1024 * 1024      # h1 scratch <= 8 MiB

    x = state.astype(jnp.bfloat16)       # halves HBM traffic, MXU-native
    if b_pad != B:
        x = jnp.pad(x, ((0, b_pad - B), (0, 0)))

    w1_bf = w1.astype(jnp.bfloat16)
    w2_bf = w2.astype(jnp.bfloat16)
    w3_row = jnp.asarray(w3, jnp.float32).reshape(1, F2).astype(jnp.bfloat16)
    b1_f = jnp.asarray(b1, jnp.float32).reshape(1, F1)
    b2_f = jnp.asarray(b2, jnp.float32).reshape(1, F2)
    b3_s = jnp.asarray(b3, jnp.float32).reshape(1, 1)

    def resident(shape):
        return pl.BlockSpec(shape, lambda p, i: (0, 0))

    if keep_h1:
        # x tiles stream only during pass 0; pass 1 reads h1 from VMEM scratch,
        # so its index_map collapses to block 0 (no redundant x DMAs).
        x_spec = pl.BlockSpec((tile_b, D), lambda p, i: (i * (1 - p), 0))
        h1_shape = (b_pad, F1)
    else:
        x_spec = pl.BlockSpec((tile_b, D), lambda p, i: (i, 0))
        h1_shape = (8, F1)                                # unused dummy

    kernel = functools.partial(_fused_kernel, batch=B, tile_b=tile_b,
                               keep_h1=keep_h1, mask_last=mask_last)

    out = pl.pallas_call(
        kernel,
        out_shape=jax.ShapeDtypeStruct((1, b_pad), jnp.float32),
        grid=(2, nb),
        in_specs=[
            x_spec,                                       # state rows (bf16)
            resident((D, F1)),                            # w1 (bf16), resident
            resident((1, F1)),                            # b1 (f32)
            resident((F1, F2)),                           # w2 (bf16)
            resident((1, F2)),                            # b2 (f32)
            resident((1, F2)),                            # w3 as a lane row
            pl.BlockSpec(memory_space=pltpu.MemorySpace.SMEM),  # b3 scalar
        ],
        out_specs=pl.BlockSpec((1, tile_b), lambda p, i: (0, i)),
        scratch_shapes=[
            pltpu.VMEM(h1_shape, jnp.float32),            # resident h1
            pltpu.VMEM((1, F1), jnp.float32),             # sum
            pltpu.VMEM((1, F1), jnp.float32),             # sum of squares
            pltpu.VMEM((1, F1), jnp.float32),             # mean
            pltpu.VMEM((1, F1), jnp.float32),             # rstd
        ],
        compiler_params=pltpu.CompilerParams(
            dimension_semantics=("arbitrary", "arbitrary"),
            vmem_limit_bytes=32 * 1024 * 1024),
    )(x, w1_bf, b1_f, w2_bf, b2_f, w3_row, b3_s)

    return out[0, :B][:, None]


def init_params(key, input_dim, fc1_units=128, fc2_units=128):
    """Deterministic init mirroring the PyTorch reset_parameters semantics.

    Note: hidden_init() uses weight.size()[0] == out_features as "fan_in"
    (quirk of the original code) -> lim = 1/sqrt(out_features).
    Biases keep PyTorch's default Linear init: U(-1/sqrt(in), 1/sqrt(in)).
    Weights stored as (in, out).
    """
    ks = jax.random.split(key, 6)
    lim1 = 1.0 / math.sqrt(fc1_units)
    lim2 = 1.0 / math.sqrt(fc2_units)
    w1 = jax.random.uniform(ks[0], (input_dim, fc1_units), jnp.float32, -lim1, lim1)
    b1 = jax.random.uniform(ks[1], (1, fc1_units), jnp.float32,
                            -1.0 / math.sqrt(input_dim), 1.0 / math.sqrt(input_dim))
    w2 = jax.random.uniform(ks[2], (fc1_units, fc2_units), jnp.float32, -lim2, lim2)
    b2 = jax.random.uniform(ks[3], (1, fc2_units), jnp.float32,
                            -1.0 / math.sqrt(fc1_units), 1.0 / math.sqrt(fc1_units))
    w3 = jax.random.uniform(ks[4], (fc2_units, 1), jnp.float32, -0.003, 0.003)
    b3 = jax.random.uniform(ks[5], (1, 1), jnp.float32,
                            -1.0 / math.sqrt(fc2_units), 1.0 / math.sqrt(fc2_units))
    return (w1, b1, w2, b2, w3, b3)


def value_forward_ref(state, params):
    """Pure-f32 reference matching the PyTorch forward (training-mode BN)."""
    w1, b1, w2, b2, w3, b3 = params
    h1 = jnp.maximum(state @ w1 + b1, 0.0)
    mean = jnp.mean(h1, axis=0, keepdims=True)
    var = jnp.mean((h1 - mean) ** 2, axis=0, keepdims=True)
    hn = (h1 - mean) * jax.lax.rsqrt(var + BN_EPS)
    h2 = jnp.maximum(hn @ w2 + b2, 0.0)
    return h2 @ w3 + b3


def value_forward_ref_bf16(state, params):
    """Reference using the same bf16-in / f32-accumulate matmul policy."""
    w1, b1, w2, b2, w3, b3 = params
    x = state.astype(jnp.bfloat16)
    h1 = jnp.dot(x, w1.astype(jnp.bfloat16),
                 preferred_element_type=jnp.float32) + b1
    h1 = jnp.maximum(h1, 0.0)
    mean = jnp.mean(h1, axis=0, keepdims=True)
    var = jnp.mean((h1 - mean) ** 2, axis=0, keepdims=True)
    hn = (h1 - mean) * jax.lax.rsqrt(var + BN_EPS)
    h2 = jnp.dot(hn.astype(jnp.bfloat16), w2.astype(jnp.bfloat16),
                 preferred_element_type=jnp.float32) + b2
    h2 = jnp.maximum(h2, 0.0)
    return jnp.dot(h2.astype(jnp.bfloat16), w3.astype(jnp.bfloat16),
                   preferred_element_type=jnp.float32) + b3


if __name__ == "__main__":
    key = jax.random.PRNGKey(0)
    k_x, k_x2, k_p = jax.random.split(key, 3)

    batch, input_dim = 20, 32   # not a multiple of 16 -> exercises padding/mask
    state = jax.random.normal(k_x, (batch, input_dim), dtype=jnp.float32)
    params = init_params(k_p, input_dim)

    ref_bf16 = value_forward_ref_bf16(state, params)
    ref_f32 = value_forward_ref(state, params)

    # Default path: single 256-row tile, h1 resident in VMEM.
    out = jax.block_until_ready(value_forward(state, params))
    assert out.shape == (batch, 1)
    assert jnp.allclose(out, ref_bf16, atol=2e-3, rtol=2e-3), \
        float(jnp.max(jnp.abs(out - ref_bf16)))
    assert jnp.allclose(out, ref_f32, atol=5e-2, rtol=5e-2), \
        float(jnp.max(jnp.abs(out - ref_f32)))

    # Multi-tile path: tiny tiles force several grid steps, exercising the
    # cross-tile BN accumulation and the last-tile-only padding mask.
    out_tiled = jax.block_until_ready(
        value_forward(state, params, max_tile_b=16))
    assert jnp.allclose(out_tiled, ref_bf16, atol=2e-3, rtol=2e-3), \
        float(jnp.max(jnp.abs(out_tiled - ref_bf16)))

    # Recompute fallback (large-B code path): fc1 recomputed in pass 1.
    out_rc = jax.block_until_ready(
        value_forward(state, params, max_tile_b=16, keep_h1=False))
    assert jnp.allclose(out_rc, ref_bf16, atol=2e-3, rtol=2e-3), \
        float(jnp.max(jnp.abs(out_rc - ref_bf16)))

    # Tile-aligned batch: no padding mask at all (mask code omitted at trace).
    state32 = jax.random.normal(k_x2, (32, input_dim), dtype=jnp.float32)
    ref32 = value_forward_ref_bf16(state32, params)
    out32 = jax.block_until_ready(
        value_forward(state32, params, max_tile_b=16))
    assert jnp.allclose(out32, ref32, atol=2e-3, rtol=2e-3), \
        float(jnp.max(jnp.abs(out32 - ref32)))

    print("KERNEL_OK")
</pallas_src>

<mosaic_0001>
module attributes {stable_mosaic.version = 11 : i64} {
  func.func @_fused_kernel(%arg0: i32, %arg1: i32, %arg2: memref<256x32xbf16, #tpu.memory_space<vmem>>, %arg3: memref<32x128xbf16, #tpu.memory_space<vmem>>, %arg4: memref<1x128xf32, #tpu.memory_space<vmem>>, %arg5: memref<128x128xbf16, #tpu.memory_space<vmem>>, %arg6: memref<1x128xf32, #tpu.memory_space<vmem>>, %arg7: memref<1x128xbf16, #tpu.memory_space<vmem>>, %arg8: memref<1x1xf32, #tpu.memory_space<smem>>, %arg9: memref<1x256xf32, #tpu.memory_space<vmem>>, %arg10: memref<256x128xf32, #tpu.memory_space<vmem>>, %arg11: memref<1x128xf32, #tpu.memory_space<vmem>>, %arg12: memref<1x128xf32, #tpu.memory_space<vmem>>, %arg13: memref<1x128xf32, #tpu.memory_space<vmem>>, %arg14: memref<1x128xf32, #tpu.memory_space<vmem>>) attributes {dimension_semantics = [#tpu.dimension_semantics<arbitrary>, #tpu.dimension_semantics<arbitrary>], iteration_bounds = array<i64: 2, 1>, scalar_prefetch = 0 : i64, scratch_operands = 5 : i64, tpu.core_type = #tpu.core_type<tc>, window_params = [{transform_indices = @transform_0, window_bounds = array<i64: 256, 32>}, {pipeline_mode = #tpu.pipeline_mode<synchronous>, transform_indices = @transform_1, window_bounds = array<i64: 32, 128>}, {pipeline_mode = #tpu.pipeline_mode<synchronous>, transform_indices = @transform_2, window_bounds = array<i64: 1, 128>}, {pipeline_mode = #tpu.pipeline_mode<synchronous>, transform_indices = @transform_3, window_bounds = array<i64: 128, 128>}, {pipeline_mode = #tpu.pipeline_mode<synchronous>, transform_indices = @transform_4, window_bounds = array<i64: 1, 128>}, {pipeline_mode = #tpu.pipeline_mode<synchronous>, transform_indices = @transform_5, window_bounds = array<i64: 1, 128>}, {transform_indices = @transform_6, window_bounds = array<i64: 1, 1>}, {transform_indices = @transform_7, window_bounds = array<i64: 1, 256>}]} {
    %c0_i32 = arith.constant 0 : i32
    %0 = arith.cmpi eq, %arg0, %c0_i32 : i32
    %1 = arith.extui %0 : i1 to i32
    %c0_i32_0 = arith.constant 0 : i32
    %2 = arith.cmpi ne, %1, %c0_i32_0 : i32
    scf.if %2 {
      %c0_i32_2 = arith.constant 0 : i32
      %6 = arith.cmpi eq, %arg1, %c0_i32_2 : i32
      %7 = arith.extui %6 : i1 to i32
      %c0_i32_3 = arith.constant 0 : i32
      %8 = arith.cmpi ne, %7, %c0_i32_3 : i32
      scf.if %8 {
        %cst_17 = arith.constant 0.000000e+00 : f32
        %30 = vector.broadcast %cst_17 : f32 to vector<1x128xf32>
        %c0_18 = arith.constant 0 : index
        %c0_19 = arith.constant 0 : index
        %31 = vector.load %arg11[%c0_18, %c0_19] : memref<1x128xf32, #tpu.memory_space<vmem>>, vector<1x128xf32>
        tpu.vector_store %arg11[%c0_18, %c0_19], %30 {strides = array<i32>} : memref<1x128xf32, #tpu.memory_space<vmem>>, vector<1x128xf32>,
        %cst_20 = arith.constant 0.000000e+00 : f32
        %32 = vector.broadcast %cst_20 : f32 to vector<1x128xf32>
        %c0_21 = arith.constant 0 : index
        %c0_22 = arith.constant 0 : index
        %33 = vector.load %arg12[%c0_21, %c0_22] : memref<1x128xf32, #tpu.memory_space<vmem>>, vector<1x128xf32>
        tpu.vector_store %arg12[%c0_21, %c0_22], %32 {strides = array<i32>} : memref<1x128xf32, #tpu.memory_space<vmem>>, vector<1x128xf32>,
      } else {
      }
      %c0 = arith.constant 0 : index
      %c0_4 = arith.constant 0 : index
      %9 = vector.load %arg2[%c0, %c0_4] : memref<256x32xbf16, #tpu.memory_space<vmem>>, vector<256x32xbf16>
      %c0_5 = arith.constant 0 : index
      %c0_6 = arith.constant 0 : index
      %10 = vector.load %arg3[%c0_5, %c0_6] : memref<32x128xbf16, #tpu.memory_space<vmem>>, vector<32x128xbf16>
      %cst = arith.constant dense<0.000000e+00> : vector<256x128xf32>
      %11 = tpu.matmul %9, %10, %cst {dimension_numbers = #tpu.dot_dimension_numbers<[1], [0], [0], [1], [0, 0, 1, 1], [], []>} : vector<256x32xbf16>, vector<32x128xbf16>, vector<256x128xf32> -> vector<256x128xf32>
      %c0_7 = arith.constant 0 : index
      %c0_8 = arith.constant 0 : index
      %12 = vector.load %arg4[%c0_7, %c0_8] : memref<1x128xf32, #tpu.memory_space<vmem>>, vector<1x128xf32>
      %13 = vector.broadcast %12 : vector<1x128xf32> to vector<256x128xf32>
      %14 = arith.addf %11, %13 : vector<256x128xf32>
      %cst_9 = arith.constant 0.000000e+00 : f32
      %15 = vector.broadcast %cst_9 : f32 to vector<256x128xf32>
      %16 = arith.maximumf %14, %15 : vector<256x128xf32>
      %c256_i32 = arith.constant 256 : i32
      %17 = arith.muli %arg1, %c256_i32 : i32
      %18 = tpu.assume_multiple %17, 256 : i32
      %19 = arith.index_cast %18 : i32 to index
      %c0_10 = arith.constant 0 : index
      %20 = vector.load %arg10[%19, %c0_10] : memref<256x128xf32, #tpu.memory_space<vmem>>, vector<256x128xf32>
      tpu.vector_store %arg10[%19, %c0_10], %16 {strides = array<i32>} : memref<256x128xf32, #tpu.memory_space<vmem>>, vector<256x128xf32>,
      %c0_i32_11 = arith.constant 0 : i32
      %21 = arith.cmpi eq, %arg1, %c0_i32_11 : i32
      %22 = arith.extui %21 : i1 to i32
      %c0_i32_12 = arith.constant 0 : i32
      %23 = arith.cmpi ne, %22, %c0_i32_12 : i32
      scf.if %23 {
        %c256_i32_17 = arith.constant 256 : i32
        %30 = arith.muli %arg1, %c256_i32_17 : i32
        %31 = tpu.iota {dimensions = array<i32: 0>} : vector<256x1xi32>
        %32 = vector.broadcast %30 : i32 to vector<256x1xi32>
        %33 = arith.addi %32, %31 : vector<256x1xi32>
        %c20_i32 = arith.constant 20 : i32
        %34 = vector.broadcast %c20_i32 : i32 to vector<256x1xi32>
        %35 = arith.cmpi slt, %33, %34 : vector<256x1xi32>
        %cst_18 = arith.constant 0.000000e+00 : f32
        %36 = vector.shape_cast %35 : vector<256x1xi1> to vector<256x1xi1>
        %37 = vector.broadcast %36 : vector<256x1xi1> to vector<256x128xi1>
        %38 = vector.broadcast %cst_18 : f32 to vector<256x128xf32>
        %39 = arith.select %37, %16, %38 : vector<256x128xi1>, vector<256x128xf32>
        %c0_19 = arith.constant 0 : index
        %c0_20 = arith.constant 0 : index
        %40 = vector.load %arg11[%c0_19, %c0_20] : memref<1x128xf32, #tpu.memory_space<vmem>>, vector<1x128xf32>
        %cst_21 = arith.constant dense<0.000000e+00> : vector<128xf32>
        %41 = vector.multi_reduction <add>, %39, %cst_21 [0] : vector<256x128xf32> to vector<128xf32>
        %42 = vector.shape_cast %41 : vector<128xf32> to vector<1x128xf32>
        %43 = arith.addf %40, %42 : vector<1x128xf32>
        %c0_22 = arith.constant 0 : index
        %c0_23 = arith.constant 0 : index
        %44 = vector.load %arg11[%c0_22, %c0_23] : memref<1x128xf32, #tpu.memory_space<vmem>>, vector<1x128xf32>
        tpu.vector_store %arg11[%c0_22, %c0_23], %43 {strides = array<i32>} : memref<1x128xf32, #tpu.memory_space<vmem>>, vector<1x128xf32>,
        %c0_24 = arith.constant 0 : index
        %c0_25 = arith.constant 0 : index
        %45 = vector.load %arg12[%c0_24, %c0_25] : memref<1x128xf32, #tpu.memory_space<vmem>>, vector<1x128xf32>
        %46 = arith.mulf %39, %39 : vector<256x128xf32>
        %cst_26 = arith.constant dense<0.000000e+00> : vector<128xf32>
        %47 = vector.multi_reduction <add>, %46, %cst_26 [0] : vector<256x128xf32> to vector<128xf32>
        %48 = vector.shape_cast %47 : vector<128xf32> to vector<1x128xf32>
        %49 = arith.addf %45, %48 : vector<1x128xf32>
        %c0_27 = arith.constant 0 : index
        %c0_28 = arith.constant 0 : index
        %50 = vector.load %arg12[%c0_27, %c0_28] : memref<1x128xf32, #tpu.memory_space<vmem>>, vector<1x128xf32>
        tpu.vector_store %arg12[%c0_27, %c0_28], %49 {strides = array<i32>} : memref<1x128xf32, #tpu.memory_space<vmem>>, vector<1x128xf32>,
      } else {
      }
      %c0_i32_13 = arith.constant 0 : i32
      %24 = arith.cmpi ne, %arg1, %c0_i32_13 : i32
      %25 = arith.extui %24 : i1 to i32
      %c0_i32_14 = arith.constant 0 : i32
      %26 = arith.cmpi ne, %25, %c0_i32_14 : i32
      scf.if %26 {
        %c0_17 = arith.constant 0 : index
        %c0_18 = arith.constant 0 : index
        %30 = vector.load %arg11[%c0_17, %c0_18] : memref<1x128xf32, #tpu.memory_space<vmem>>, vector<1x128xf32>
        %cst_19 = arith.constant dense<0.000000e+00> : vector<128xf32>
        %31 = vector.multi_reduction <add>, %16, %cst_19 [0] : vector<256x128xf32> to vector<128xf32>
        %32 = vector.shape_cast %31 : vector<128xf32> to vector<1x128xf32>
        %33 = arith.addf %30, %32 : vector<1x128xf32>
        %c0_20 = arith.constant 0 : index
        %c0_21 = arith.constant 0 : index
        %34 = vector.load %arg11[%c0_20, %c0_21] : memref<1x128xf32, #tpu.memory_space<vmem>>, vector<1x128xf32>
        tpu.vector_store %arg11[%c0_20, %c0_21], %33 {strides = array<i32>} : memref<1x128xf32, #tpu.memory_space<vmem>>, vector<1x128xf32>,
        %c0_22 = arith.constant 0 : index
        %c0_23 = arith.constant 0 : index
        %35 = vector.load %arg12[%c0_22, %c0_23] : memref<1x128xf32, #tpu.memory_space<vmem>>, vector<1x128xf32>
        %36 = arith.mulf %16, %16 : vector<256x128xf32>
        %cst_24 = arith.constant dense<0.000000e+00> : vector<128xf32>
        %37 = vector.multi_reduction <add>, %36, %cst_24 [0] : vector<256x128xf32> to vector<128xf32>
        %38 = vector.shape_cast %37 : vector<128xf32> to vector<1x128xf32>
        %39 = arith.addf %35, %38 : vector<1x128xf32>
        %c0_25 = arith.constant 0 : index
        %c0_26 = arith.constant 0 : index
        %40 = vector.load %arg12[%c0_25, %c0_26] : memref<1x128xf32, #tpu.memory_space<vmem>>, vector<1x128xf32>
        tpu.vector_store %arg12[%c0_25, %c0_26], %39 {strides = array<i32>} : memref<1x128xf32, #tpu.memory_space<vmem>>, vector<1x128xf32>,
      } else {
      }
      %c0_i32_15 = arith.constant 0 : i32
      %27 = arith.cmpi eq, %arg1, %c0_i32_15 : i32
      %28 = arith.extui %27 : i1 to i32
      %c0_i32_16 = arith.constant 0 : i32
      %29 = arith.cmpi ne, %28, %c0_i32_16 : i32
      scf.if %29 {
        %c0_17 = arith.constant 0 : index
        %c0_18 = arith.constant 0 : index
        %30 = vector.load %arg11[%c0_17, %c0_18] : memref<1x128xf32, #tpu.memory_space<vmem>>, vector<1x128xf32>
        %cst_19 = arith.constant 5.000000e-02 : f32
        %31 = vector.broadcast %cst_19 : f32 to vector<1x128xf32>
        %32 = arith.mulf %30, %31 : vector<1x128xf32>
        %c0_20 = arith.constant 0 : index
        %c0_21 = arith.constant 0 : index
        %33 = vector.load %arg12[%c0_20, %c0_21] : memref<1x128xf32, #tpu.memory_space<vmem>>, vector<1x128xf32>
        %cst_22 = arith.constant 5.000000e-02 : f32
        %34 = vector.broadcast %cst_22 : f32 to vector<1x128xf32>
        %35 = arith.mulf %33, %34 : vector<1x128xf32>
        %36 = arith.mulf %32, %32 : vector<1x128xf32>
        %37 = arith.subf %35, %36 : vector<1x128xf32>
        %cst_23 = arith.constant 0.000000e+00 : f32
        %38 = vector.broadcast %cst_23 : f32 to vector<1x128xf32>
        %39 = arith.maximumf %37, %38 : vector<1x128xf32>
        %c0_24 = arith.constant 0 : index
        %c0_25 = arith.constant 0 : index
        %40 = vector.load %arg13[%c0_24, %c0_25] : memref<1x128xf32, #tpu.memory_space<vmem>>, vector<1x128xf32>
        tpu.vector_store %arg13[%c0_24, %c0_25], %32 {strides = array<i32>} : memref<1x128xf32, #tpu.memory_space<vmem>>, vector<1x128xf32>,
        %cst_26 = arith.constant 9.99999974E-6 : f32
        %41 = vector.broadcast %cst_26 : f32 to vector<1x128xf32>
        %42 = arith.addf %39, %41 : vector<1x128xf32>
        %43 = math.rsqrt %42 : vector<1x128xf32>
        %c0_27 = arith.constant 0 : index
        %c0_28 = arith.constant 0 : index
        %44 = vector.load %arg14[%c0_27, %c0_28] : memref<1x128xf32, #tpu.memory_space<vmem>>, vector<1x128xf32>
        tpu.vector_store %arg14[%c0_27, %c0_28], %43 {strides = array<i32>} : memref<1x128xf32, #tpu.memory_space<vmem>>, vector<1x128xf32>,
      } else {
      }
    } else {
    }
    %c1_i32 = arith.constant 1 : i32
    %3 = arith.cmpi eq, %arg0, %c1_i32 : i32
    %4 = arith.extui %3 : i1 to i32
    %c0_i32_1 = arith.constant 0 : i32
    %5 = arith.cmpi ne, %4, %c0_i32_1 : i32
    scf.if %5 {
      %c256_i32 = arith.constant 256 : i32
      %6 = arith.muli %arg1, %c256_i32 : i32
      %7 = tpu.assume_multiple %6, 256 : i32
      %8 = arith.index_cast %7 : i32 to index
      %c0 = arith.constant 0 : index
      %9 = vector.load %arg10[%8, %c0] : memref<256x128xf32, #tpu.memory_space<vmem>>, vector<256x128xf32>
      %c0_2 = arith.constant 0 : index
      %c0_3 = arith.constant 0 : index
      %10 = vector.load %arg13[%c0_2, %c0_3] : memref<1x128xf32, #tpu.memory_space<vmem>>, vector<1x128xf32>
      %11 = vector.broadcast %10 : vector<1x128xf32> to vector<256x128xf32>
      %12 = arith.subf %9, %11 : vector<256x128xf32>
      %c0_4 = arith.constant 0 : index
      %c0_5 = arith.constant 0 : index
      %13 = vector.load %arg14[%c0_4, %c0_5] : memref<1x128xf32, #tpu.memory_space<vmem>>, vector<1x128xf32>
      %14 = vector.broadcast %13 : vector<1x128xf32> to vector<256x128xf32>
      %15 = arith.mulf %12, %14 : vector<256x128xf32>
      %16 = arith.truncf %15 : vector<256x128xf32> to vector<256x128xbf16>
      %c0_6 = arith.constant 0 : index
      %c0_7 = arith.constant 0 : index
      %17 = vector.load %arg5[%c0_6, %c0_7] : memref<128x128xbf16, #tpu.memory_space<vmem>>, vector<128x128xbf16>
      %cst = arith.constant dense<0.000000e+00> : vector<256x128xf32>
      %18 = tpu.matmul %16, %17, %cst {dimension_numbers = #tpu.dot_dimension_numbers<[1], [0], [0], [1], [0, 0, 1, 1], [], []>} : vector<256x128xbf16>, vector<128x128xbf16>, vector<256x128xf32> -> vector<256x128xf32>
      %c0_8 = arith.constant 0 : index
      %c0_9 = arith.constant 0 : index
      %19 = vector.load %arg6[%c0_8, %c0_9] : memref<1x128xf32, #tpu.memory_space<vmem>>, vector<1x128xf32>
      %20 = vector.broadcast %19 : vector<1x128xf32> to vector<256x128xf32>
      %21 = arith.addf %18, %20 : vector<256x128xf32>
      %cst_10 = arith.constant 0.000000e+00 : f32
      %22 = vector.broadcast %cst_10 : f32 to vector<256x128xf32>
      %23 = arith.maximumf %21, %22 : vector<256x128xf32>
      %c0_11 = arith.constant 0 : index
      %c0_12 = arith.constant 0 : index
      %24 = vector.load %arg7[%c0_11, %c0_12] : memref<1x128xbf16, #tpu.memory_space<vmem>>, vector<1x128xbf16>
      %25 = arith.truncf %23 : vector<256x128xf32> to vector<256x128xbf16>
      %cst_13 = arith.constant dense<0.000000e+00> : vector<1x256xf32>
      %26 = tpu.matmul %24, %25, %cst_13 {dimension_numbers = #tpu.dot_dimension_numbers<[1], [1], [0], [0], [0, 0, 1, 0], [], []>} : vector<1x128xbf16>, vector<256x128xbf16>, vector<1x256xf32> -> vector<1x256xf32>
      %c0_14 = arith.constant 0 : index
      %c0_15 = arith.constant 0 : index
      %27 = memref.load %arg8[%c0_14, %c0_15] : memref<1x1xf32, #tpu.memory_space<smem>>
      %28 = vector.broadcast %27 : f32 to vector<1x256xf32>
      %29 = arith.addf %26, %28 : vector<1x256xf32>
      %c0_16 = arith.constant 0 : index
      %c0_17 = arith.constant 0 : index
      %30 = vector.load %arg9[%c0_16, %c0_17] : memref<1x256xf32, #tpu.memory_space<vmem>>, vector<1x256xf32>
      tpu.vector_store %arg9[%c0_16, %c0_17], %29 {strides = array<i32>} : memref<1x256xf32, #tpu.memory_space<vmem>>, vector<1x256xf32>,
    } else {
    }
    return
  }
  func.func @transform_0(%arg0: i32, %arg1: i32) -> (i32, i32) {
    %c1_i32 = arith.constant 1 : i32
    %0 = arith.subi %c1_i32, %arg0 : i32
    %1 = arith.muli %arg1, %0 : i32
    %c0_i32 = arith.constant 0 : i32
    %c0_i32_0 = arith.constant 0 : i32
    return %1, %c0_i32 : i32, i32
  }
  func.func @transform_1(%arg0: i32, %arg1: i32) -> (i32, i32) {
    %c0_i32 = arith.constant 0 : i32
    %c0_i32_0 = arith.constant 0 : i32
    %c0_i32_1 = arith.constant 0 : i32
    return %c0_i32, %c0_i32_0 : i32, i32
  }
  func.func @transform_2(%arg0: i32, %arg1: i32) -> (i32, i32) {
    %c0_i32 = arith.constant 0 : i32
    %c0_i32_0 = arith.constant 0 : i32
    %c0_i32_1 = arith.constant 0 : i32
    return %c0_i32, %c0_i32_0 : i32, i32
  }
  func.func @transform_3(%arg0: i32, %arg1: i32) -> (i32, i32) {
    %c0_i32 = arith.constant 0 : i32
    %c0_i32_0 = arith.constant 0 : i32
    %c0_i32_1 = arith.constant 0 : i32
    return %c0_i32, %c0_i32_0 : i32, i32
  }
  func.func @transform_4(%arg0: i32, %arg1: i32) -> (i32, i32) {
    %c0_i32 = arith.constant 0 : i32
    %c0_i32_0 = arith.constant 0 : i32
    %c0_i32_1 = arith.constant 0 : i32
    return %c0_i32, %c0_i32_0 : i32, i32
  }
  func.func @transform_5(%arg0: i32, %arg1: i32) -> (i32, i32) {
    %c0_i32 = arith.constant 0 : i32
    %c0_i32_0 = arith.constant 0 : i32
    %c0_i32_1 = arith.constant 0 : i32
    return %c0_i32, %c0_i32_0 : i32, i32
  }
  func.func @transform_6(%arg0: i32, %arg1: i32) -> (i32, i32) {
    %c0_i32 = arith.constant 0 : i32
    %c0_i32_0 = arith.constant 0 : i32
    %c0_i32_1 = arith.constant 0 : i32
    return %c0_i32, %c0_i32_0 : i32, i32
  }
  func.func @transform_7(%arg0: i32, %arg1: i32) -> (i32, i32) {
    %c0_i32 = arith.constant 0 : i32
    %c0_i32_0 = arith.constant 0 : i32
    return %c0_i32, %arg1 : i32, i32
  }
}

</mosaic_0001>

<bundles_post_ra>
// kernel: tpu_custom_call.1
= control target key start
LH: loop header
LB: loop body
LE: loop exit
PB: predicated region body
PF: predicated region fallthrough
CT: control target
= control target key end

     0   :  { %s2417_s0 = inlined_call_operand.vmem [shape: bf16[256,32], index: 0, kind: input, shape index: {}]   ;;  %s2418_s1 = inlined_call_operand.vmem [shape: bf16[32,128], index: 1, kind: input, shape index: {}]   ;;  %s2419_s2 = inlined_call_operand.vmem [shape: f32[1,128], index: 2, kind: input, shape index: {}]   ;;  %s2420_s3 = inlined_call_operand.vmem [shape: bf16[128,128], index: 3, kind: input, shape index: {}]   ;;  %s2421_s4 = inlined_call_operand.vmem [shape: f32[1,128], index: 4, kind: input, shape index: {}]   ;;  %s2422_s5 = inlined_call_operand.vmem [shape: bf16[1,128], index: 5, kind: input, shape index: {}]   ;;  %s2423_s6 = inlined_call_operand.<no memory space> [shape: f32[1,1], index: 6, kind: input, shape index: {}]   ;;  %s2424_s7 = inlined_call_operand.hbm [shape: f32[1,256], index: 7, kind: output, shape index: {}]  }
   0x1   :  { %12 = sst [smem:[#allocation7]] %s2423_s6 }
   0x2   :  { %13 = vsyncpa [#allocation9], 0  ;;  %s2068_s26 = smov 0   ;;  %s2070_s27 = smov 0  }
   0x3   :  { %s2072_s28 = smov 0  }
   0x4 LB: > { %s1704_s6 = sadd.s32 4294967295, %s2020_s28   ;;  %s31_s29 = sadd.s32 1, %s2016_s27  ;;  %s2020_s28 = sphi %s2072_s28, %s19_s28   ;;  %s2016_s27 = sphi %s2070_s27, %s2427_s27   ;;  %s2012_s26 = sphi %s2068_s26, %s2426_s26  }
   0x5   : > { %p33_p0 = scmp.ge.s32.totalorder %s31_s29, 2  ;;  %p1708_p1 = scmp.ge.s32.totalorder %s2020_s28, 1 }
   0x6   : > { %p260_p2 = scmp.lt.s32.totalorder %s2020_s28, 3 }
   0x7   : > { %s2429_s29 = smov (%p33_p0, %s31_s29), 0 }
   0x8   : > { %p261_p3 = pnand %p1708_p1, %p260_p2 }
   0x9   : > { %p1709_p4 = scmp.ne.s32.totalorder (!%p261_p3), %s2012_s26, 0 }
   0xa   : > { %264 = sbr.rel (%p261_p3) target bundleno = 865 (0x361), region = 48 }
   0xf   : > { %304 = sbr.rel (%p1709_p4) target bundleno = 283 (0x11b), region = 52 }
  0x14   : > { %v1942_v0 = vld [vmem:[%s2418_s1 + $0x8] sm:$0xff]   ;;  %v1943_v1 = vld [vmem:[%s2418_s1] sm:$0xff]   ;;  %vm446_vm0 = vcmask 261120   ;;  %v1948_v6 = vld [vmem:[%s2417_s0 + $0x10] sm:$0xff]   ;;  %v2022_v18 = vmov 0.0   ;;  %v725_v19 = vlaneseq }
  0x15   : > { %1821 = vmatprep.subr.bf16.mxu0 %v1942_v0  ;;  %v1944_v2 = vld [vmem:[%s2417_s0] sm:$0xff]   ;;  %1905 = vmatprep.subr.bf16.mxu1 %v1942_v0  ;;  %v1945_v3 = vld [vmem:[%s2417_s0 + $0x8] sm:$0xff]   ;;  %v1949_v7 = vld [vmem:[%s2417_s0 + $0x50] sm:$0xff]   ;;  %309 = vst [vmem:[#allocation3] sm:$0x1] %v2022_v18 }
  0x16   : > { %1822 = vmatpush3.bf16.msra.mxu0 %v1942_v0  ;;  %1907 = vmatpush3.bf16.msra.mxu1 %v1942_v0  ;;  %v1946_v4 = vld [vmem:[%s2417_s0 + $0x40] sm:$0xff]   ;;  %v1947_v5 = vld [vmem:[%s2417_s0 + $0x48] sm:$0xff]   ;;  %v1950_v8 = vld [vmem:[%s2417_s0 + $0x18] sm:$0xff]   ;;  %310 = vst [vmem:[#allocation4] sm:$0x1] %v2022_v18  ;;  %v726_v20 = vshrl.u32 %v725_v19, 7 }
  0x17   : > { %1823 = vmatprep.subr.bf16.mxu0 %v1943_v1  ;;  %1825 = vmatprep.mubr.msk.bf16.mxu0 %vm446_vm0, %v1944_v2  ;;  %v1951_v9 = vld [vmem:[%s2417_s0 + $0x58] sm:$0xff]   ;;  %v1952_v10 = vld [vmem:[%s2417_s0 + $0x20] sm:$0xff]   ;;  %v1954_v12 = vld [vmem:[%s2417_s0 + $0x28] sm:$0xff]  }
  0x18   : > { %1906 = vmatprep.subr.bf16.mxu1 %v1943_v1  ;;  %1841 = vmatprep.mubr.msk.bf16.mxu1 %vm446_vm0, %v1946_v4  ;;  %v1953_v11 = vld [vmem:[%s2417_s0 + $0x60] sm:$0xff]   ;;  %v1955_v13 = vld [vmem:[%s2417_s0 + $0x68] sm:$0xff]   ;;  %v1956_v14 = vld [vmem:[%s2417_s0 + $0x30] sm:$0xff]   ;;  %v728_v25 = vadd.s32 16, %v726_v20 }
  0x19   : > { %v1957_v15 = vld [vmem:[%s2417_s0 + $0x70] sm:$0xff]   ;;  %v1958_v16 = vld [vmem:[%s2417_s0 + $0x38] sm:$0xff]   ;;  %v2163_v21 = vld [vmem:[%s2419_s2] ss:$0 sm:$0xff] }
  0x1a   : > { %1824 = vmatpush3.bf16.msra.mxu0 %v1943_v1  ;;  %1908 = vmatpush3.bf16.msra.mxu1 %v1943_v1  ;;  %v1959_v17 = vld [vmem:[%s2417_s0 + $0x78] sm:$0xff]   ;;  %vm793_vm1 = vcmp.lt.s32.totalorder %v728_v25, 20 }
  0x1d   : > { %1826 = vmatmul.mubr.msk.bf16.vlgmr.msra.gmra.mxu0 %vm446_vm0, %v1945_v3  ;;  %1842 = vmatmul.mubr.msk.bf16.vlgmr.msra.gmra.mxu1 %vm446_vm0, %v1947_v5 }
  0x1e   : > { %1829 = vmatprep.mubr.msk.bf16.mxu0 %vm446_vm0, %v1948_v6  ;;  %1845 = vmatprep.mubr.msk.bf16.mxu1 %vm446_vm0, %v1949_v7 }
  0x25   : > { %1830 = vmatmul.mubr.msk.bf16.gmra.mxu0 %vm446_vm0, %v1950_v8  ;;  %1846 = vmatmul.mubr.msk.bf16.gmra.mxu1 %vm446_vm0, %v1951_v9 }
  0x26   : > { %1833 = vmatprep.mubr.msk.bf16.mxu0 %vm446_vm0, %v1952_v10  ;;  %1849 = vmatprep.mubr.msk.bf16.mxu1 %vm446_vm0, %v1953_v11 }
  0x2d   : > { %1834 = vmatmul.mubr.msk.bf16.gmra.mxu0 %vm446_vm0, %v1954_v12  ;;  %1850 = vmatmul.mubr.msk.bf16.gmra.mxu1 %vm446_vm0, %v1955_v13 }
  0x2e   : > { %1837 = vmatprep.mubr.msk.bf16.mxu0 %vm446_vm0, %v1956_v14  ;;  %1853 = vmatprep.mubr.msk.bf16.mxu1 %vm446_vm0, %v1957_v15 }
  0x35   : > { %1838 = vmatmul.mubr.msk.bf16.gmra.mxu0 %vm446_vm0, %v1958_v16  ;;  %1854 = vmatmul.mubr.msk.bf16.gmra.mxu1 %vm446_vm0, %v1959_v17 }
  0xdd   : > { %v1827_v22 = vpop.f32.mrf.mxu0  ;;  %v1843_v23 = vpop.f32.mrf.mxu1 }
  0xde   : > { %v538_v24 = vadd.f32 %v1827_v22, %v2163_v21  ;;  %v602_v26 = vadd.f32 %v1843_v23, %v2163_v21 }
  0xdf   : > { %v529_v27 = vpop.f32.mrf.mxu0  ;;  %v593_v28 = vpop.f32.mrf.mxu1 }
  0xe0   : > { %v658_v29 = vmax.f32 %v538_v24, 0.0  ;;  %v530_v30 = vadd.f32 %v2163_v21, %v529_v27  ;;  %v674_v31 = vmax.f32 %v602_v26, 0.0  ;;  %v594_v32 = vadd.f32 %v2163_v21, %v593_v28 }
  0xe1   : > { %v1828_v33 = vpop.f32.mrf.mxu0  ;;  %v1844_v34 = vpop.f32.mrf.mxu1 }
  0xe2   : > { %692 = vst [vmem:[#allocation2 + $0xd8] sm:$0xff] %v658_v29  ;;  %v656_v35 = vmax.f32 %v530_v30, 0.0  ;;  %v541_v36 = vadd.f32 %v1828_v33, %v2163_v21  ;;  %708 = vst [vmem:[#allocation2 + $0x40] sm:$0xff] %v674_v31  ;;  %v672_v37 = vmax.f32 %v594_v32, 0.0  ;;  %v605_v39 = vadd.f32 %v1844_v34, %v2163_v21 }
  0xe3   : > { %v532_v38 = vpop.f32.mrf.mxu0  ;;  %v596_v40 = vpop.f32.mrf.mxu1  ;;  %v889_v44 = vsel %vm793_vm1, %v658_v29, 0.0 }
  0xe4   : > { %690 = vst [vmem:[#allocation2 + $0xb0] sm:$0xff] %v656_v35  ;;  %v659_v41 = vmax.f32 %v541_v36, 0.0  ;;  %v533_v42 = vadd.f32 %v2163_v21, %v532_v38  ;;  %706 = vst [vmem:[#allocation2 + $0x38] sm:$0xff] %v672_v37  ;;  %v597_v43 = vadd.f32 %v2163_v21, %v596_v40  ;;  %v675_v45 = vmax.f32 %v605_v39, 0.0 }
  0xe5   : > { %v1831_v46 = vpop.f32.mrf.mxu0  ;;  %v1847_v47 = vpop.f32.mrf.mxu1  ;;  %v960_v52 = vmul.f32 %v656_v35, %v656_v35  ;;  %v962_v59 = vmul.f32 %v889_v44, %v889_v44 }
  0xe6   : > { %693 = vst [vmem:[#allocation2 + $0x18] sm:$0xff] %v659_v41  ;;  %v657_v48 = vmax.f32 %v533_v42, 0.0  ;;  %v673_v49 = vmax.f32 %v597_v43, 0.0  ;;  %v554_v50 = vadd.f32 %v1831_v46, %v2163_v21  ;;  %v618_v51 = vadd.f32 %v1847_v47, %v2163_v21  ;;  %709 = vst [vmem:[#allocation2 + $0xc8] sm:$0xff] %v675_v45  ;;  %v919_v45 = vld [vmem:[#allocation3] sm:$0x1] }
  0xe7   : > { %v545_v53 = vpop.f32.mrf.mxu0  ;;  %v609_v54 = vpop.f32.mrf.mxu1 }
  0xe8   : > { %691 = vst [vmem:[#allocation2] sm:$0xff] %v657_v48  ;;  %v920_v55 = vadd.f32 %v657_v48, %v656_v35  ;;  %v961_v56 = vmul.f32 %v657_v48, %v657_v48  ;;  %707 = vst [vmem:[#allocation2 + $0x58] sm:$0xff] %v673_v49  ;;  %v662_v57 = vmax.f32 %v554_v50, 0.0  ;;  %v678_v58 = vmax.f32 %v618_v51, 0.0 }
  0xe9   : > { %v546_v60 = vadd.f32 %v2163_v21, %v545_v53  ;;  %v610_v61 = vadd.f32 %v2163_v21, %v609_v54  ;;  %v1832_v62 = vpop.f32.mrf.mxu0  ;;  %v1848_v63 = vpop.f32.mrf.mxu1  ;;  %v959_v54 = vld [vmem:[#allocation4] sm:$0x1] }
  0xea   : > { %v921_v0 = vadd.f32 %v920_v55, %v889_v44  ;;  %v992_v1 = vadd.f32 %v961_v56, %v960_v52  ;;  %696 = vst [vmem:[#allocation2 + $0x30] sm:$0xff] %v662_v57  ;;  %712 = vst [vmem:[#allocation2 + $0x70] sm:$0xff] %v678_v58  ;;  %v557_v2 = vadd.f32 %v1832_v62, %v2163_v21 }
  0xeb   : > { %v621_v3 = vadd.f32 %v1848_v63, %v2163_v21  ;;  %v660_v4 = vmax.f32 %v546_v60, 0.0  ;;  %v676_v5 = vmax.f32 %v610_v61, 0.0  ;;  %v548_v6 = vpop.f32.mrf.mxu0  ;;  %v612_v7 = vpop.f32.mrf.mxu1 }
  0xec   : > { %v951_v8 = vrot.slane %v921_v0, 4  ;;  %v993_v9 = vadd.f32 %v992_v1, %v962_v59  ;;  %v663_v10 = vmax.f32 %v557_v2, 0.0  ;;  %v549_v12 = vadd.f32 %v2163_v21, %v548_v6 }
  0xed   : > { %v679_v11 = vmax.f32 %v621_v3, 0.0  ;;  %694 = vst [vmem:[#allocation2 + $0x50] sm:$0xff] %v660_v4  ;;  %710 = vst [vmem:[#allocation2 + $0xe0] sm:$0xff] %v676_v5  ;;  %v613_v13 = vadd.f32 %v2163_v21, %v612_v7  ;;  %v1835_v14 = vpop.f32.mrf.mxu0  ;;  %v1851_v15 = vpop.f32.mrf.mxu1 }
  0xee   : > { %v952_v16 = vadd.f32 %v951_v8, %v921_v0  ;;  %v1023_v17 = vrot.slane %v993_v9, 4  ;;  %697 = vst [vmem:[#allocation2 + $0x48] sm:$0xff] %v663_v10  ;;  %v570_v18 = vadd.f32 %v1835_v14, %v2163_v21  ;;  %v634_v19 = vadd.f32 %v1851_v15, %v2163_v21 }
  0xef   : > { %713 = vst [vmem:[#allocation2 + $0xc0] sm:$0xff] %v679_v11  ;;  %v661_v20 = vmax.f32 %v549_v12, 0.0  ;;  %v677_v22 = vmax.f32 %v613_v13, 0.0  ;;  %v561_v23 = vpop.f32.mrf.mxu0  ;;  %v625_v24 = vpop.f32.mrf.mxu1 }
  0xf0   : > { %v953_v25 = vrot.slane %v952_v16, 2  ;;  %v1024_v26 = vadd.f32 %v1023_v17, %v993_v9  ;;  %v666_v27 = vmax.f32 %v570_v18, 0.0  ;;  %v682_v28 = vmax.f32 %v634_v19, 0.0 }
  0xf1   : > { %695 = vst [vmem:[#allocation2 + $0x68] sm:$0xff] %v661_v20  ;;  %711 = vst [vmem:[#allocation2 + $0x90] sm:$0xff] %v677_v22  ;;  %v562_v29 = vadd.f32 %v2163_v21, %v561_v23  ;;  %v626_v30 = vadd.f32 %v2163_v21, %v625_v24  ;;  %v1836_v31 = vpop.f32.mrf.mxu0  ;;  %v1852_v32 = vpop.f32.mrf.mxu1 }
  0xf2   : > { %v954_v33 = vadd.f32 %v953_v25, %v952_v16  ;;  %v1025_v34 = vrot.slane %v1024_v26, 2  ;;  %700 = vst [vmem:[#allocation2 + $0xe8] sm:$0xff] %v666_v27  ;;  %716 = vst [vmem:[#allocation2 + $0x10] sm:$0xff] %v682_v28  ;;  %v573_v35 = vadd.f32 %v1836_v31, %v2163_v21  ;;  %v637_v36 = vadd.f32 %v1852_v32, %v2163_v21 }
  0xf3   : > { %v664_v37 = vmax.f32 %v562_v29, 0.0  ;;  %v680_v38 = vmax.f32 %v626_v30, 0.0  ;;  %v564_v39 = vpop.f32.mrf.mxu0  ;;  %v628_v40 = vpop.f32.mrf.mxu1 }
  0xf4   : > { %v955_v41 = vrot.slane %v954_v33, 1  ;;  %v1026_v42 = vadd.f32 %v1025_v34, %v1024_v26  ;;  %v667_v43 = vmax.f32 %v573_v35, 0.0  ;;  %v683_v44 = vmax.f32 %v637_v36, 0.0 }
  0xf5   : > { %698 = vst [vmem:[#allocation2 + $0x80] sm:$0xff] %v664_v37  ;;  %714 = vst [vmem:[#allocation2 + $0xa8] sm:$0xff] %v680_v38  ;;  %v565_v46 = vadd.f32 %v2163_v21, %v564_v39  ;;  %v629_v47 = vadd.f32 %v2163_v21, %v628_v40  ;;  %v1839_v48 = vpop.f32.mrf.mxu0  ;;  %v1855_v49 = vpop.f32.mrf.mxu1 }
  0xf6   : > { %v956_v50 = vadd.f32 %v955_v41, %v954_v33  ;;  %v1027_v51 = vrot.slane %v1026_v42, 1  ;;  %701 = vst [vmem:[#allocation2 + $0xb8] sm:$0xff] %v667_v43  ;;  %717 = vst [vmem:[#allocation2 + $0x28] sm:$0xff] %v683_v44  ;;  %v586_v52 = vadd.f32 %v1839_v48, %v2163_v21  ;;  %v650_v53 = vadd.f32 %v1855_v49, %v2163_v21 }
  0xf7   : > { %v665_v55 = vmax.f32 %v565_v46, 0.0  ;;  %v681_v56 = vmax.f32 %v629_v47, 0.0  ;;  %v577_v57 = vpop.f32.mrf.mxu0  ;;  %v641_v58 = vpop.f32.mrf.mxu1 }
  0xf8   : > { %v957_v59 = vadd.f32 %v956_v50, %v919_v45  ;;  %v1028_v60 = vadd.f32 %v1027_v51, %v1026_v42  ;;  %v670_v61 = vmax.f32 %v586_v52, 0.0  ;;  %v686_v62 = vmax.f32 %v650_v53, 0.0 }
  0xf9   : > { %699 = vst [vmem:[#allocation2 + $0x88] sm:$0xff] %v665_v55  ;;  %715 = vst [vmem:[#allocation2 + $0xd0] sm:$0xff] %v681_v56  ;;  %v578_v63 = vadd.f32 %v2163_v21, %v577_v57  ;;  %v642_v0 = vadd.f32 %v2163_v21, %v641_v58  ;;  %v1840_v1 = vpop.f32.mrf.mxu0  ;;  %v1856_v2 = vpop.f32.mrf.mxu1 }
  0xfa   : > { %958 = vst [vmem:[#allocation3] sm:$0x1] %v957_v59  ;;  %v1029_v3 = vadd.f32 %v1028_v60, %v959_v54  ;;  %704 = vst [vmem:[#allocation2 + $0x8] sm:$0xff] %v670_v61  ;;  %v589_v4 = vadd.f32 %v1840_v1, %v2163_v21  ;;  %v653_v5 = vadd.f32 %v1856_v2, %v2163_v21 }
  0xfb   : > { %720 = vst [vmem:[#allocation2 + $0x20] sm:$0xff] %v686_v62  ;;  %v668_v6 = vmax.f32 %v578_v63, 0.0  ;;  %v684_v7 = vmax.f32 %v642_v0, 0.0  ;;  %v580_v8 = vpop.f32.mrf.mxu0  ;;  %v644_v9 = vpop.f32.mrf.mxu1 }
  0xfc   : > { %1030 = vst [vmem:[#allocation4] sm:$0x1] %v1029_v3  ;;  %v671_v10 = vmax.f32 %v589_v4, 0.0  ;;  %v687_v11 = vmax.f32 %v653_v5, 0.0  ;;  %v581_v12 = vadd.f32 %v2163_v21, %v580_v8  ;;  %v645_v13 = vadd.f32 %v2163_v21, %v644_v9 }
  0xfd   : > { %702 = vst [vmem:[#allocation2 + $0x60] sm:$0xff] %v668_v6  ;;  %718 = vst [vmem:[#allocation2 + $0xa0] sm:$0xff] %v684_v7 }
  0xfe   : > { %705 = vst [vmem:[#allocation2 + $0x78] sm:$0xff] %v671_v10  ;;  %721 = vst [vmem:[#allocation2 + $0x98] sm:$0xff] %v687_v11  ;;  %v669_v14 = vmax.f32 %v581_v12, 0.0  ;;  %v685_v15 = vmax.f32 %v645_v13, 0.0 }
 0x100   : > { %703 = vst [vmem:[#allocation2 + $0xf0] sm:$0xff] %v669_v14  ;;  %719 = vst [vmem:[#allocation2 + $0xf8] sm:$0xff] %v685_v15 }
 0x101   : > { %v1150_v16 = vld [vmem:[#allocation3] sm:$0x1] }
 0x102   : > { %v1151_v17 = vmul.f32 0.05, %v1150_v16 }
 0x103   : > { %v1152_v18 = vld [vmem:[#allocation4] sm:$0x1] }
 0x104   : > { %v1153_v19 = vmul.f32 0.05, %v1152_v18  ;;  %v1154_v20 = vmul.f32 %v1151_v17, %v1151_v17  ;;  %1157 = vst [vmem:[#allocation5] sm:$0x1] %v1151_v17 }
 0x106   : > { %v1155_v22 = vsub.f32 %v1153_v19, %v1154_v20 }
 0x108   : > { %v1156_v23 = vmax.f32 %v1155_v22, 0.0 }
 0x10a   : > { %v1158_v24 = vadd.f32 1e-05, %v1156_v23 }
 0x10c   : > { %1960 = vrsqrt.f32 %v1158_v24 }
 0x119   : > { %v1961_v25 = vpop.eup %1960 }
 0x11a   : > { %1160 = vst [vmem:[#allocation6] sm:$0x1] %v1961_v25 }
 0x11b PF: > { %p1745_p5 = scmp.ne.s32.totalorder %s2012_s26, 1 }
 0x11c   : > { %s1574_s30 = sld [smem:[#allocation7]] (!%p1745_p5) }
 0x11d   : > { %1164 = sbr.rel (%p1745_p5) target bundleno = 850 (0x352), region = 72 }
 0x122   : > { %v1962_v21 = vld [vmem:[%s2420_s3 + $0x38] sm:$0xff]   ;;  %v1963_v26 = vld [vmem:[%s2420_s3 + $0x30] sm:$0xff]   ;;  %v1964_v27 = vld [vmem:[%s2420_s3 + $0x28] sm:$0xff]  }
 0x123   : > { %1857 = vmatprep.subr.bf16.mxu0 %v1962_v21  ;;  %v1965_v28 = vld [vmem:[%s2420_s3 + $0x20] sm:$0xff]   ;;  %v1167_v29 = vld [vmem:[#allocation2 + $0xb0] sm:$0xff]  ;;  %v1966_v37 = vld [vmem:[%s2420_s3 + $0x18] sm:$0xff]  }
 0x124   : > { %1858 = vmatpush3.bf16.msra.mxu0 %v1962_v21  ;;  %v1168_v30 = vld [vmem:[#allocation2] sm:$0xff]  ;;  %v1967_v39 = vld [vmem:[%s2420_s3 + $0x10] sm:$0xff]   ;;  %v1169_v40 = vld [vmem:[#allocation2 + $0xd8] sm:$0xff] }
 0x125   : > { %1859 = vmatprep.subr.bf16.mxu0 %v1963_v26  ;;  %v2210_v31 = vld [vmem:[#allocation5] ss:$0 sm:$0xff]  ;;  %v2214_v34 = vld [vmem:[#allocation6] ss:$0 sm:$0xff]  ;;  %v1170_v41 = vld [vmem:[#allocation2 + $0x18] sm:$0xff] }
 0x126   : > { %v1206_v32 = vsub.f32 %v1167_v29, %v2210_v31  ;;  %v1207_v33 = vsub.f32 %v1168_v30, %v2210_v31  ;;  %v1171_v42 = vld [vmem:[#allocation2 + $0x50] sm:$0xff]  ;;  %v1968_v43 = vld [vmem:[%s2420_s3 + $0x8] sm:$0xff]   ;;  %v1208_v45 = vsub.f32 %v1169_v40, %v2210_v31  ;;  %v1209_v46 = vsub.f32 %v1170_v41, %v2210_v31  ;;  %v1195_v51 = vld [vmem:[#allocation2 + $0xa0] sm:$0xff] }
 0x127   : > { %v1172_v44 = vld [vmem:[#allocation2 + $0x68] sm:$0xff]  ;;  %v1210_v47 = vsub.f32 %v1171_v42, %v2210_v31  ;;  %v1193_v48 = vld [vmem:[#allocation2 + $0x10] sm:$0xff]  ;;  %v1196_v52 = vld [vmem:[#allocation2 + $0xf8] sm:$0xff]  ;;  %v1234_v62 = vsub.f32 %v1195_v51, %v2210_v31 }
 0x128   : > { %1860 = vmatpush3.bf16.msra.mxu0 %v1963_v26  ;;  %v1245_v35 = vmul.f32 %v2214_v34, %v1206_v32  ;;  %v1246_v36 = vmul.f32 %v2214_v34, %v1207_v33  ;;  %v1194_v49 = vld [vmem:[#allocation2 + $0x28] sm:$0xff]  ;;  %v1211_v50 = vsub.f32 %v1172_v44, %v2210_v31  ;;  %v1969_v53 = vld [vmem:[%s2420_s3] sm:$0xff]   ;;  %v1247_v55 = vmul.f32 %v2214_v34, %v1208_v45  ;;  %v1198_v58 = vld [vmem:[#allocation2 + $0x98] sm:$0xff] }
 0x129   : > { %1861 = vmatprep.subr.bf16.mxu0 %v1964_v27  ;;  %v1197_v54 = vld [vmem:[#allocation2 + $0x20] sm:$0xff]  ;;  %v1232_v56 = vsub.f32 %v1193_v48, %v2210_v31  ;;  %v1233_v57 = vsub.f32 %v1194_v49, %v2210_v31  ;;  %v1248_v59 = vmul.f32 %v2214_v34, %v1209_v46  ;;  %v1249_v60 = vmul.f32 %v2214_v34, %v1210_v47  ;;  %v1173_v61 = vld [vmem:[#allocation2 + $0x30] sm:$0xff]  ;;  %v1174_v1 = vld [vmem:[#allocation2 + $0x48] sm:$0xff] }
 0x12a   : > { %v1277_v38 = vpack.c.bf16 %v1246_v36, %v1245_v35  ;;  %v1235_v63 = vsub.f32 %v1196_v52, %v2210_v31  ;;  %v1250_v0 = vmul.f32 %v2214_v34, %v1211_v50  ;;  %v1236_v4 = vsub.f32 %v1197_v54, %v2210_v31  ;;  %v1175_v5 = vld [vmem:[#allocation2 + $0x80] sm:$0xff]  ;;  %v1176_v6 = vld [vmem:[#allocation2 + $0x88] sm:$0xff]  ;;  %v1178_v26 = vld [vmem:[#allocation2 + $0xb8] sm:$0xff] }
 0x12b   : > { %v2243_v2 = vmul.f32 %v2214_v34, %v1232_v56  ;;  %v2246_v3 = vmul.f32 %v2214_v34, %v1233_v57  ;;  %v2250_v7 = vmul.f32 %v2214_v34, %v1234_v62  ;;  %v1237_v9 = vsub.f32 %v1198_v58, %v2210_v31  ;;  %v1177_v21 = vld [vmem:[#allocation2 + $0xe8] sm:$0xff]  ;;  %v1182_v42 = vld [vmem:[#allocation2 + $0x78] sm:$0xff]  ;;  %v1187_v57 = vld [vmem:[#allocation2 + $0xe0] sm:$0xff] }
 0x12c   : > { %1862 = vmatpush3.bf16.msra.mxu0 %v1964_v27  ;;  %1873 = vmatprep.mubr.bf16.mxu0 %v1277_v38  ;;  %v2253_v8 = vmul.f32 %v2214_v34, %v1235_v63  ;;  %v1212_v10 = vsub.f32 %v1173_v61, %v2210_v31  ;;  %v2260_v12 = vmul.f32 %v2214_v34, %v1236_v4  ;;  %v1179_v27 = vld [vmem:[#allocation2 + $0x60] sm:$0xff]  ;;  %v1181_v41 = vld [vmem:[#allocation2 + $0x8] sm:$0xff]  ;;  %v1184_v44 = vld [vmem:[#allocation2 + $0x58] sm:$0xff] }
 0x12d   : > { %1863 = vmatprep.subr.bf16.mxu0 %v1965_v28  ;;  %v1290_v11 = vpack.c.bf16 %v2246_v3, %v2243_v2  ;;  %v1278_v13 = vpack.c.bf16 %v1248_v59, %v1247_v55  ;;  %v1213_v14 = vsub.f32 %v1174_v1, %v2210_v31  ;;  %v2266_v16 = vmul.f32 %v2214_v34, %v1237_v9  ;;  %v1185_v55 = vld [vmem:[#allocation2 + $0x40] sm:$0xff]  ;;  %v1186_v56 = vld [vmem:[#allocation2 + $0xc8] sm:$0xff]  ;;  %v1188_v58 = vld [vmem:[#allocation2 + $0x90] sm:$0xff] }
 0x12e   : > { %v1291_v15 = vpack.c.bf16 %v2253_v8, %v2250_v7  ;;  %v1279_v17 = vpack.c.bf16 %v1250_v0, %v1249_v60  ;;  %v1214_v18 = vsub.f32 %v1175_v5, %v2210_v31  ;;  %v1215_v19 = vsub.f32 %v1176_v6, %v2210_v31  ;;  %v1189_v9 = vld [vmem:[#allocation2 + $0x70] sm:$0xff]  ;;  %v2326_v2 = vld [vmem:[%s2421_s4] ss:$0 sm:$0xff] }
 0x12f   : > { %v1292_v20 = vpack.c.bf16 %v2266_v16, %v2260_v12  ;;  %v1251_v22 = vmul.f32 %v2214_v34, %v1212_v10  ;;  %v1252_v23 = vmul.f32 %v2214_v34, %v1213_v14  ;;  %v1216_v30 = vsub.f32 %v1177_v21, %v2210_v31  ;;  %v1190_v10 = vld [vmem:[#allocation2 + $0xc0] sm:$0xff]  ;;  %v1192_v14 = vld [vmem:[#allocation2 + $0xd0] sm:$0xff] }
 0x130   : > { %1864 = vmatpush3.bf16.msra.mxu0 %v1965_v28  ;;  %v1253_v24 = vmul.f32 %v2214_v34, %v1214_v18  ;;  %v1254_v25 = vmul.f32 %v2214_v34, %v1215_v19  ;;  %v1180_v28 = vld [vmem:[#allocation2 + $0xf0] sm:$0xff]  ;;  %v1217_v32 = vsub.f32 %v1178_v26, %v2210_v31  ;;  %v1218_v35 = vsub.f32 %v1179_v27, %v2210_v31 }
 0x131   : > { %1865 = vmatprep.subr.bf16.mxu0 %v1966_v37  ;;  %v1280_v29 = vpack.c.bf16 %v1252_v23, %v1251_v22  ;;  %v1219_v36 = vsub.f32 %v1180_v28, %v2210_v31  ;;  %v1220_v46 = vsub.f32 %v1181_v41, %v2210_v31  ;;  %v1221_v47 = vsub.f32 %v1182_v42, %v2210_v31 }
 0x132   : > { %v1281_v33 = vpack.c.bf16 %v1254_v25, %v1253_v24  ;;  %v1256_v38 = vmul.f32 %v2214_v34, %v1217_v32  ;;  %v1223_v50 = vsub.f32 %v1184_v44, %v2210_v31  ;;  %v1224_v60 = vsub.f32 %v1185_v55, %v2210_v31 }
 0x133   : > { %v1258_v40 = vmul.f32 %v2214_v34, %v1219_v36  ;;  %v1259_v51 = vmul.f32 %v2214_v34, %v1220_v46  ;;  %v1260_v52 = vmul.f32 %v2214_v34, %v1221_v47  ;;  %v1225_v61 = vsub.f32 %v1186_v56, %v2210_v31 }
 0x134   : > { %1866 = vmatpush3.bf16.msra.mxu0 %v1966_v37  ;;  %v1255_v37 = vmul.f32 %v2214_v34, %v1216_v30  ;;  %v1262_v54 = vmul.f32 %v2214_v34, %v1223_v50  ;;  %v1226_v63 = vsub.f32 %v1187_v57, %v2210_v31  ;;  %v1227_v0 = vsub.f32 %v1188_v58, %v2210_v31 }
 0x135   : > { %1867 = vmatprep.subr.bf16.mxu0 %v1967_v39  ;;  %v1284_v59 = vpack.c.bf16 %v1260_v52, %v1259_v51  ;;  %v1263_v1 = vmul.f32 %v2214_v34, %v1224_v60  ;;  %v1264_v4 = vmul.f32 %v2214_v34, %v1225_v61  ;;  %v1228_v18 = vsub.f32 %v1189_v9, %v2210_v31 }
 0x136   : > { %v1282_v45 = vpack.c.bf16 %v1256_v38, %v1255_v37  ;;  %v1265_v5 = vmul.f32 %v2214_v34, %v1226_v63  ;;  %v1266_v6 = vmul.f32 %v2214_v34, %v1227_v0  ;;  %v1229_v19 = vsub.f32 %v1190_v10, %v2210_v31 }
 0x137   : > { %v1231_v24 = vsub.f32 %v1192_v14, %v2210_v31  ;;  %v1267_v25 = vmul.f32 %v2214_v34, %v1228_v18 }
 0x138   : > { %1868 = vmatpush3.bf16.msra.mxu0 %v1967_v39  ;;  %v1257_v39 = vmul.f32 %v2214_v34, %v1218_v35  ;;  %v1287_v22 = vpack.c.bf16 %v1266_v6, %v1265_v5  ;;  %v1268_v21 = vmul.f32 %v2214_v34, %v1229_v19 }
 0x139   : > { %1869 = vmatprep.subr.bf16.mxu0 %v1968_v43  ;;  %v1270_v27 = vmul.f32 %v2214_v34, %v1231_v24 }
 0x13a   : > { %v1283_v48 = vpack.c.bf16 %v1258_v40, %v1257_v39  ;;  %v1288_v28 = vpack.c.bf16 %v1268_v21, %v1267_v25 }
 0x13c   : > { %1870 = vmatpush3.bf16.msra.mxu0 %v1968_v43  ;;  %v1183_v43 = vld [vmem:[#allocation2 + $0x38] sm:$0xff] }
 0x13d   : > { %1871 = vmatprep.subr.bf16.mxu0 %v1969_v53  ;;  %v1222_v49 = vsub.f32 %v1183_v43, %v2210_v31 }
 0x140   : > { %1872 = vmatpush3.bf16.msra.mxu0 %v1969_v53  ;;  %v1261_v53 = vmul.f32 %v2214_v34, %v1222_v49 }
 0x142   : > { %v1285_v62 = vpack.c.bf16 %v1262_v54, %v1261_v53 }
 0x143   : > { %1874 = vmatmul.mubr.bf16.vlgmr.msra.gmra.mxu0 %v1278_v13  ;;  %v1191_v13 = vld [vmem:[#allocation2 + $0xa8] sm:$0xff] }
 0x144   : > { %1877 = vmatprep.mubr.bf16.mxu0 %v1279_v17  ;;  %v1286_v17 = vpack.c.bf16 %v1264_v4, %v1263_v1  ;;  %v1230_v23 = vsub.f32 %v1191_v13, %v2210_v31  ;;  %v2320_v31 = vld [vmem:[%s2422_s5] sm:$0x1] }
 0x145   : > { %1819 = vmatprep.mubr.bf16.mxu1 %v2320_v31 }
 0x146   : > { %v1269_v26 = vmul.f32 %v2214_v34, %v1230_v23 }
 0x14b   : > { %1878 = vmatmul.mubr.bf16.gmra.mxu0 %v1280_v29  ;;  %v1289_v29 = vpack.c.bf16 %v1270_v27, %v1269_v26 }
 0x14c   : > { %1881 = vmatprep.mubr.bf16.mxu0 %v1281_v33 }
 0x153   : > { %1882 = vmatmul.mubr.bf16.gmra.mxu0 %v1282_v45 }
 0x154   : > { %1885 = vmatprep.mubr.bf16.mxu0 %v1283_v48 }
 0x15b   : > { %1886 = vmatmul.mubr.bf16.gmra.mxu0 %v1284_v59 }
 0x15c   : > { %1889 = vmatprep.mubr.bf16.mxu0 %v1285_v62 }
 0x163   : > { %1890 = vmatmul.mubr.bf16.gmra.mxu0 %v1286_v17 }
 0x164   : > { %1893 = vmatprep.mubr.bf16.mxu0 %v1287_v22 }
 0x16b   : > { %1894 = vmatmul.mubr.bf16.gmra.mxu0 %v1288_v28 }
 0x16c   : > { %1897 = vmatprep.mubr.bf16.mxu0 %v1289_v29 }
 0x173   : > { %1898 = vmatmul.mubr.bf16.gmra.mxu0 %v1290_v11 }
 0x174   : > { %1901 = vmatprep.mubr.bf16.mxu0 %v1291_v15 }
 0x17b   : > { %1902 = vmatmul.mubr.bf16.gmra.mxu0 %v1292_v20 }
 0x203   : > { %v1875_v34 = vpop.f32.mrf.mxu0 }
 0x204   : > { %v1407_v7 = vadd.f32 %v1875_v34, %v2326_v2 }
 0x205   : > { %v1398_v3 = vpop.f32.mrf.mxu0 }
 0x206   : > { %v1399_v11 = vadd.f32 %v2326_v2, %v1398_v3  ;;  %v1527_v16 = vmax.f32 %v1407_v7, 0.0 }
 0x207   : > { %v1876_v8 = vpop.f32.mrf.mxu0 }
 0x208   : > { %v1410_v12 = vadd.f32 %v1876_v8, %v2326_v2  ;;  %v1525_v33 = vmax.f32 %v1399_v11, 0.0 }
 0x209   : > { %v1401_v15 = vpop.f32.mrf.mxu0 }
 0x20a   : > { %v1528_v20 = vmax.f32 %v1410_v12, 0.0  ;;  %v1402_v30 = vadd.f32 %v2326_v2, %v1401_v15 }
 0x20b   : > { %v1879_v32 = vpop.f32.mrf.mxu0 }
 0x20c   : > { %v2332_v35 = vpack.c.bf16 %v1528_v20, %v1527_v16  ;;  %v1526_v36 = vmax.f32 %v1402_v30, 0.0  ;;  %v1423_v39 = vadd.f32 %v1879_v32, %v2326_v2 }
 0x20d   : > { %v1414_v37 = vpop.f32.mrf.mxu0 }
 0x20e   : > { %v2334_v38 = vpack.c.bf16 %v1526_v36, %v1525_v33  ;;  %v1415_v41 = vadd.f32 %v2326_v2, %v1414_v37  ;;  %v1531_v44 = vmax.f32 %v1423_v39, 0.0 }
 0x20f   : > { %v1880_v40 = vpop.f32.mrf.mxu0 }
 0x210   : > { %v1426_v42 = vadd.f32 %v1880_v40, %v2326_v2  ;;  %v1529_v48 = vmax.f32 %v1415_v41, 0.0 }
 0x211   : > { %v1417_v43 = vpop.f32.mrf.mxu0 }
 0x212   : > { %v1532_v45 = vmax.f32 %v1426_v42, 0.0  ;;  %v1418_v46 = vadd.f32 %v2326_v2, %v1417_v43 }
 0x213   : > { %v2340_v47 = vpop.f32.mrf.mxu0 }
 0x214   : > { %v2342_v49 = vpack.c.bf16 %v1532_v45, %v1531_v44  ;;  %v1530_v50 = vmax.f32 %v1418_v46, 0.0 }
 0x215   : > { %v2344_v51 = vpop.f32.mrf.mxu0 }
 0x216   : > { %v2346_v52 = vpack.c.bf16 %v1530_v50, %v1529_v48 }
 0x217   : > { %v1884_v53 = vpop.f32.mrf.mxu0 }
 0x218   : > { %v1442_v50 = vadd.f32 %v1884_v53, %v2326_v2 }
 0x219   : > { %v2348_v54 = vpop.f32.mrf.mxu0 }
 0x21b   : > { %v1887_v55 = vpop.f32.mrf.mxu0 }
 0x21c   : > { %v1455_v34 = vadd.f32 %v1887_v55, %v2326_v2 }
 0x21d   : > { %v1446_v56 = vpop.f32.mrf.mxu0 }
 0x21e   : > { %v1539_v30 = vmax.f32 %v1455_v34, 0.0  ;;  %v1447_v42 = vadd.f32 %v2326_v2, %v1446_v56 }
 0x21f   : > { %v1888_v57 = vpop.f32.mrf.mxu0 }
 0x220   : > { %v1458_v27 = vadd.f32 %v1888_v57, %v2326_v2  ;;  %v1537_v46 = vmax.f32 %v1447_v42, 0.0 }
 0x221   : > { %v1449_v58 = vpop.f32.mrf.mxu0 }
 0x222   : > { %v1540_v11 = vmax.f32 %v1458_v27, 0.0  ;;  %v1450_v37 = vadd.f32 %v2326_v2, %v1449_v58 }
 0x223   : > { %v1891_v59 = vpop.f32.mrf.mxu0 }
 0x224   : > { %v1471_v61 = vadd.f32 %v1891_v59, %v2326_v2  ;;  %v1565_v39 = vpack.c.bf16 %v1540_v11, %v1539_v30  ;;  %v1538_v44 = vmax.f32 %v1450_v37, 0.0  ;;  %v1439_v59 = vadd.f32 %v2340_v47, %v2326_v2 }
 0x225   : > { %v1462_v60 = vpop.f32.mrf.mxu0 }
 0x226   : > { %v1463_v63 = vadd.f32 %v2326_v2, %v1462_v60  ;;  %v1543_v4 = vmax.f32 %v1471_v61, 0.0  ;;  %v1564_v55 = vpack.c.bf16 %v1538_v44, %v1537_v46  ;;  %v1536_v60 = vmax.f32 %v1442_v50, 0.0 }
 0x227   : > { %v1892_v62 = vpop.f32.mrf.mxu0 }
 0x228   : > { %v1474_v0 = vadd.f32 %v1892_v62, %v2326_v2  ;;  %v1541_v10 = vmax.f32 %v1463_v63, 0.0  ;;  %v1535_v62 = vmax.f32 %v1439_v59, 0.0 }
 0x229   : > { %v1465_v1 = vpop.f32.mrf.mxu0 }
 0x22a   : > { %v1544_v5 = vmax.f32 %v1474_v0, 0.0  ;;  %v1466_v6 = vadd.f32 %v2326_v2, %v1465_v1  ;;  %v1563_v0 = vpack.c.bf16 %v1536_v60, %v1535_v62  ;;  %v1434_v1 = vadd.f32 %v2326_v2, %v2348_v54 }
 0x22b   : > { %v1895_v9 = vpop.f32.mrf.mxu0 }
 0x22c   : > { %v2354_v13 = vpack.c.bf16 %v1544_v5, %v1543_v4  ;;  %v1542_v14 = vmax.f32 %v1466_v6, 0.0  ;;  %v1431_v5 = vadd.f32 %v2326_v2, %v2344_v51  ;;  %v1487_v47 = vadd.f32 %v1895_v9, %v2326_v2 }
 0x22d   : > { %v2356_v17 = vpop.f32.mrf.mxu0  ;;  %v1534_v6 = vmax.f32 %v1434_v1, 0.0 }
 0x22e   : > { %v2358_v18 = vpack.c.bf16 %v1542_v14, %v1541_v10  ;;  %v1533_v14 = vmax.f32 %v1431_v5, 0.0  ;;  %v1479_v54 = vadd.f32 %v2326_v2, %v2356_v17  ;;  %v1623_v17 = vlaneseq }
 0x22f   : > { %v1896_v19 = vpop.f32.mrf.mxu0 }
 0x230   : > { %v1490_v53 = vadd.f32 %v1896_v19, %v2326_v2  ;;  %v1624_v27 = vshrl.u32 %v1623_v17, 7  ;;  %vm1637_vm2 = vcmp.lt.s32.totalorder %v1623_v17, 256 }
 0x231   : > { %v1481_v22 = vpop.f32.mrf.mxu0 }
 0x232   : > { %v1548_v10 = vmax.f32 %v1490_v53, 0.0 }
 0x233   : > { %v1899_v23 = vpop.f32.mrf.mxu0 }
 0x234   : > { %v1503_v43 = vadd.f32 %v1899_v23, %v2326_v2  ;;  %v1547_v23 = vmax.f32 %v1487_v47, 0.0 }
 0x235   : > { %v1494_v24 = vpop.f32.mrf.mxu0 }
 0x236   : > { %v1551_v48 = vmax.f32 %v1503_v43, 0.0  ;;  %v1495_v56 = vadd.f32 %v2326_v2, %v1494_v24  ;;  %v1562_v24 = vpack.c.bf16 %v1534_v6, %v1533_v14 }
 0x237   : > { %v1900_v25 = vpop.f32.mrf.mxu0 }
 0x238   : > { %v1506_v40 = vadd.f32 %v1900_v25, %v2326_v2  ;;  %v1549_v63 = vmax.f32 %v1495_v56, 0.0  ;;  %v1569_v25 = vpack.c.bf16 %v1548_v10, %v1547_v23 }
 0x239   : > { %v1497_v21 = vpop.f32.mrf.mxu0 }
 0x23a   : > { %v1552_v45 = vmax.f32 %v1506_v40, 0.0  ;;  %v1498_v58 = vadd.f32 %v2326_v2, %v1497_v21  ;;  %v1482_v21 = vadd.f32 %v2326_v2, %v1481_v22 }
 0x23b   : > { %v1903_v26 = vpop.f32.mrf.mxu0 }
 0x23c   : > { %v1519_v29 = vadd.f32 %v1903_v26, %v2326_v2  ;;  %v1571_v57 = vpack.c.bf16 %v1552_v45, %v1551_v48  ;;  %v1550_v61 = vmax.f32 %v1498_v58, 0.0  ;;  %v1546_v19 = vmax.f32 %v1482_v21, 0.0 }
 0x23d   : > { %v1510_v28 = vpop.f32.mrf.mxu0  ;;  %v1545_v26 = vmax.f32 %v1479_v54, 0.0 }
 0x23e   : > { %v1511_v7 = vadd.f32 %v2326_v2, %v1510_v28  ;;  %v1555_v15 = vmax.f32 %v1519_v29, 0.0  ;;  %v1570_v4 = vpack.c.bf16 %v1550_v61, %v1549_v63 }
 0x23f   : > { %v1904_v3 = vpop.f32.mrf.mxu0  ;;  %v1568_v51 = vpack.c.bf16 %v1546_v19, %v1545_v26 }
 0x240   : > { %v1522_v8 = vadd.f32 %v1904_v3, %v2326_v2  ;;  %v1553_v32 = vmax.f32 %v1511_v7, 0.0 }
 0x241   : > { %v1513_v12 = vpop.f32.mrf.mxu0 }
 0x242   : > { %v1556_v16 = vmax.f32 %v1522_v8, 0.0  ;;  %v1514_v20 = vadd.f32 %v2326_v2, %v1513_v12  ;;  %v2023_v2 = vmov 1966171168  }
 0x243   : > { %v1621_v9 = vunpack.c.l.s4 %v2023_v2 }
 0x244   : > { %v1554_v33 = vmax.f32 %v1514_v20, 0.0  ;;  %v1573_v36 = vpack.c.bf16 %v1556_v16, %v1555_v15 }
 0x245   : > { %v1622_v22 = vunpack.c.0.s8 %v1621_v9 }
 0x246   : > { %v1572_v41 = vpack.c.bf16 %v1554_v33, %v1553_v32  ;;  %1803 = vmatprep.subr.bf16.mxu1 %v1573_v36 }
 0x247   : > { %1804 = vmatpush3.bf16.xpose.msra.mxu1 %v1565_v39 }
 0x248   : > { %1805 = vmatprep.subr.bf16.mxu1 %v1572_v41 }
 0x24f   : > { %1806 = vmatpush3.bf16.xpose.msra.mxu1 %v1564_v55 }
 0x250   : > { %1807 = vmatprep.subr.bf16.mxu1 %v1571_v57 }
 0x257   : > { %1808 = vmatpush3.bf16.xpose.msra.mxu1 %v1563_v0 }
 0x258   : > { %1809 = vmatprep.subr.bf16.mxu1 %v1570_v4 }
 0x25f   : > { %1810 = vmatpush3.bf16.xpose.msra.mxu1 %v1562_v24 }
 0x260   : > { %1811 = vmatprep.subr.bf16.mxu1 %v1569_v25 }
 0x267   : > { %1812 = vmatpush3.bf16.xpose.msra.mxu1 %v2342_v49  ;;  %v1575_v49 = vstv %s1574_s30 }
 0x268   : > { %1813 = vmatprep.subr.bf16.mxu1 %v1568_v51 }
 0x26f   : > { %1814 = vmatpush3.bf16.xpose.msra.mxu1 %v2346_v52 }
 0x270   : > { %1815 = vmatprep.subr.bf16.mxu1 %v2354_v13  ;;  %v1625_v13 = vsub.s32 %v1622_v22, %v1624_v27 }
 0x277   : > { %1816 = vmatpush3.bf16.xpose.msra.mxu1 %v2332_v35 }
 0x278   : > { %1817 = vmatprep.subr.bf16.mxu1 %v2358_v18 }
 0x27f   : > { %1818 = vmatpush3.bf16.xpose.msra.mxu1 %v2334_v38 }
 0x286   : > { %1820 = vmatmul.mubr.bf16.vlgmr.msra.gmra.mxu1 %v2320_v31 }
 0x346   : > { %v1610_v28 = vpop.f32.mrf.mxu1 }
 0x347   : > { %v1611_v52 = vadd.f32 %v1610_v28, %v1575_v49 }
 0x348   : > { %v1612_v29 = vpop.f32.mrf.mxu1 }
 0x349   : > { %v1613_v34 = vadd.f32 %v1612_v29, %v1575_v49 }
 0x34a   : > { %v1614_v3 = vpop.f32.mrf.mxu1 }
 0x34b   : > { %v1619_v35 = vcombine.low %v1611_v52, %v1613_v34 }
 0x34c   : > { %v1615_v7 = vpop.f32.mrf.mxu1 }
 0x34d   : > { %v1626_v18 = vrot.slane %v1619_v35, %v1625_v13 }
 0x34f   : > { %v1633_v38 = vrot.slane %v1626_v18, %v1625_v13 }
 0x351   : > { %1639 = vst.msk [vmem:[#allocation8] sm:$0x3] %vm1637_vm2, %v1633_v38 }
 0x352 PF: > { %p2393_p6 = scmp.eq.s32.totalorder %s1704_s6, 1  ;;  %s2024_s9 = smov [#allocation8]  }
 0x353   : > { %s1650_s10 = sshll.u32 %s2024_s9, 4  ;;  %s1651_s10 = int_to_ptr.vmem [resolvable:$true] %s1650_s10 }
 0x354   : > { %s1970_s11 = scalar_lea.vmem %s1651_s10, 32  ;;  %p1977_p10 = scmp.lt.s32.totalorder %s1651_s10, %s1651_s10 }
 0x355   : > { %p1971_p7 = scmp.ne.s32.totalorder %s1651_s10, %s1970_s11  ;;  %p1978_p11 = scmp.lt.s32.totalorder %s1970_s11, %s1970_s11 }
 0x357   : > { %p1972_p8 = pnand %p1971_p7, %p2393_p6  ;;  %p1979_p12 = por %p1978_p11, %p1977_p10 }
 0x359   : > { %p1973_p9 = pneg %p1972_p8 }
 0x35b   : > { %p1980_p13 = pnand %p1979_p12, %p1973_p9 }
 0x35d   : > { %1983 = shalt.err (!%p1980_p13)
}
 0x35e   : > { %1910 = dma.vmem_to_hbm [thread:$0]  (%p2393_p6), %s1651_s10, 32, %s2424_s7, [#allocation9]  }
 0x35f   : > { %2007 = dma.done.wait (%p2393_p6), [#allocation9], 32  }
 0x360   : > { %2009 = vsyncadd (%p2393_p6), [#allocation9], 4294967264 }
 0x361 PF: > { %s19_s28 = sadd.s32 1, %s2020_s28   ;;  %s2426_s26 = smov %s2016_s27 }
 0x362   : > { %p16_p0 = scmp.ge.s32.totalorder %s19_s28, 4   ;;  %s2427_s27 = smov %s2429_s29 }
 0x364   :  { %18 = sbr.rel (!%p16_p0) target bundleno = 4 (0x4), region = 102 }
 0x369   :  { %1663 = vsyncpa [#allocation9], 1 }
 0x36a   :  { %1665 = vsyncpa [#allocation9 + $0x1], 1 }

</bundles_post_ra>
